<compile_context>
chip_gen: v5e
topology: v5e:2x2
jax: 0.10.0
libtpu: 0.0.40
codegen_flags: <defaults>
</compile_context>

<pallas_src>
import functools

import jax
import jax.numpy as jnp
from jax.experimental import pallas as pl
from jax.experimental.pallas import tpu as pltpu


# ----------------------------- kernels --------------------------------------


def _se_fast_kernel(x_ref, w1t_ref, w2_ref, o_ref):
    """Whole-image(s) path: block = (Bt, C, HW)."""
    x = x_ref[...]                                    # (Bt, C, HW), input dtype
    inv_hw = 1.0 / x.shape[-1]
    # Global average pool (f32 accumulation).  The f32 cast feeds only this
    # reduction, so no slab-sized f32 copy stays live until the final multiply.
    pooled = jnp.sum(x.astype(jnp.float32), axis=-1, keepdims=True) * inv_hw  # (Bt,C,1)
    # fc1 (1x1 conv, no bias) + ReLU on the VPU: h[b,0,r] = sum_c w1t[c,r]*pooled[b,c]
    h = jnp.sum(w1t_ref[...][None, :, :] * pooled, axis=1, keepdims=True)     # (Bt,1,Cr)
    h = jnp.maximum(h, 0.0)
    # fc2 (1x1 conv, no bias) + sigmoid: s[b,c,0] = sum_r w2[c,r]*h[b,0,r]
    s = jnp.sum(w2_ref[...][None, :, :] * h, axis=-1, keepdims=True)          # (Bt,C,1)
    scale = jax.nn.sigmoid(s)
    # Apply the per-channel scale in the input dtype (no live f32 slab).
    o_ref[...] = x * scale.astype(x.dtype)


def _se_pool_kernel(x_ref, w1t_ref, w2_ref, scale_ref, acc_ref, *, hw, thw):
    """Tiled path, sweep 1: accumulate the pool over HW tiles; at the last
    tile run fc1/ReLU/fc2/sigmoid and emit the (C, 1) per-channel scale."""
    k = pl.program_id(1)

    @pl.when(k == 0)
    def _():
        acc_ref[...] = jnp.zeros_like(acc_ref)

    x = x_ref[0].astype(jnp.float32)                  # (C, thw)
    if hw % thw != 0:
        # Mask the out-of-range lanes of the (partial) last tile.
        col = jax.lax.broadcasted_iota(jnp.int32, x.shape, 1) + k * thw
        x = jnp.where(col < hw, x, 0.0)
    acc_ref[...] += jnp.sum(x, axis=-1, keepdims=True)          # (C, 1)

    @pl.when(k == pl.num_programs(1) - 1)
    def _():
        pooled = acc_ref[...] * (1.0 / hw)                            # (C, 1)
        h = jnp.sum(w1t_ref[...] * pooled, axis=0, keepdims=True)     # (1, Cr)
        h = jnp.maximum(h, 0.0)
        s = jnp.sum(w2_ref[...] * h, axis=-1, keepdims=True)          # (C, 1)
        scale_ref[0] = jax.nn.sigmoid(s)


def _se_apply_kernel(scale_ref, x_ref, o_ref):
    """Tiled path, sweep 2: per-channel scale of one HW tile."""
    x = x_ref[0]                                      # (C, thw)
    o_ref[0] = x * scale_ref[0].astype(x.dtype)       # (C, 1) broadcast on lanes


# ----------------------------- wrapper ---------------------------------------


def _vmem_capacity_bytes():
    try:
        info = pltpu.get_tpu_info()
        return int(getattr(info, "vmem_capacity_bytes", 64 << 20))
    except Exception:
        return 64 << 20   # v7x-safe fallback


def _pick_batch_block(n, io_bytes_per_image, need_bytes_per_image, fixed_need,
                      usable_vmem, target_bytes=2 << 20):
    """Largest divisor of n whose block fits VMEM; stop growing once a block
    moves >= target_bytes, and keep >= 2 grid steps when n >= 2 so the
    pipeline overlaps and both v7x TensorCores are fed."""
    best = 1
    for bt in range(1, n + 1):
        if n % bt != 0:
            continue
        if fixed_need + bt * need_bytes_per_image > usable_vmem:
            break
        if n >= 2 and n // bt < 2:
            break
        best = bt
        if bt * io_bytes_per_image >= target_bytes:
            break
    return best


def se_module_pallas(x_nchw, w_fc1, w_fc2, *, force_tile_hw=None):
    """SEModule forward.

    x_nchw: (N, C, H, W), f32 or bf16 (NCHW, as in PyTorch).
    w_fc1 : (Cr, C)  -- Conv2d(C, Cr, 1, bias=False).weight squeezed.
    w_fc2 : (C, Cr)  -- Conv2d(Cr, C, 1, bias=False).weight squeezed.
    Returns (N, C, H, W) in the dtype of x.
    """
    N, C, H, W = x_nchw.shape
    Cr = w_fc1.shape[0]
    HW = H * W
    itemsize = jnp.dtype(x_nchw.dtype).itemsize

    # Free row-major collapse of the spatial dims (no activation transpose).
    x3 = x_nchw.reshape(N, C, HW)

    # Tiny one-off weight prep: fc1 transposed to (C, Cr); fc2 native (C, Cr).
    w1t = jnp.transpose(w_fc1).astype(jnp.float32)
    w2 = w_fc2.astype(jnp.float32)

    weight_bytes = 2 * C * Cr * 4
    usable_vmem = int(0.75 * _vmem_capacity_bytes())      # ~48 MiB v7x, ~96 MiB v5e/v6e
    fixed_need = 2 * weight_bytes + (2 << 20)              # dbl-buffered weights + headroom

    io_per_img = C * HW * itemsize
    f32_tmp_per_img = C * HW * 4 if itemsize < 4 else 0    # transient cast for the pool
    need_per_img = 4 * io_per_img + f32_tmp_per_img        # dbl-buffered in + out (+ tmp)

    fast_fits = fixed_need + need_per_img <= usable_vmem

    if fast_fits and force_tile_hw is None:
        # -------------------- fast path: (Bt, C, HW) blocks ------------------
        bt = _pick_batch_block(N, io_per_img, need_per_img, fixed_need, usable_vmem)
        vmem_limit = int(min(max(fixed_need + bt * need_per_img, 32 << 20), usable_vmem))
        cost = pl.CostEstimate(
            flops=int(3 * N * C * HW + 4 * N * C * Cr),
            transcendentals=int(N * C),
            bytes_accessed=int(2 * N * C * HW * itemsize + weight_bytes),
        )
        out3 = pl.pallas_call(
            _se_fast_kernel,
            out_shape=jax.ShapeDtypeStruct((N, C, HW), x_nchw.dtype),
            grid_spec=pltpu.PrefetchScalarGridSpec(
                num_scalar_prefetch=0,
                grid=(N // bt,),
                in_specs=[
                    pl.BlockSpec((bt, C, HW), lambda i: (i, 0, 0)),
                    pl.BlockSpec((C, Cr), lambda i: (0, 0)),
                    pl.BlockSpec((C, Cr), lambda i: (0, 0)),
                ],
                out_specs=pl.BlockSpec((bt, C, HW), lambda i: (i, 0, 0)),
            ),
            compiler_params=pltpu.CompilerParams(
                dimension_semantics=("parallel",),
                vmem_limit_bytes=vmem_limit,
            ),
            cost_estimate=cost,
        )(x3, w1t, w2)
        return out3.reshape(N, C, H, W)

    # ------------- tiled path: two sweeps over HW tiles ----------------------
    if force_tile_hw is not None:
        thw = max(128, (int(force_tile_hw) // 128) * 128)
    else:
        target = 2 << 20
        thw = max(128, (target // max(C * itemsize, 1)) // 128 * 128)
        while thw > 128 and fixed_need + 4 * C * thw * itemsize + C * thw * 4 > usable_vmem:
            thw -= 128
    thw = max(128, min(thw, ((HW + 127) // 128) * 128))     # lane-dense tile size
    n_tiles = (HW + thw - 1) // thw

    tile_need = fixed_need + 4 * C * thw * itemsize + C * thw * 4 + C * 4
    vmem_limit = int(min(max(tile_need, 32 << 20), usable_vmem))

    # Sweep 1: pool + fc1/ReLU/fc2/sigmoid -> per-image (C, 1) scale.
    pool_cost = pl.CostEstimate(
        flops=int(2 * N * C * HW + 4 * N * C * Cr),
        transcendentals=int(N * C),
        bytes_accessed=int(N * C * HW * itemsize + weight_bytes + N * C * 4),
    )
    scale = pl.pallas_call(
        functools.partial(_se_pool_kernel, hw=HW, thw=thw),
        out_shape=jax.ShapeDtypeStruct((N, C, 1), jnp.float32),
        grid_spec=pltpu.PrefetchScalarGridSpec(
            num_scalar_prefetch=0,
            grid=(N, n_tiles),
            in_specs=[
                pl.BlockSpec((1, C, thw), lambda n, k: (n, 0, k)),
                pl.BlockSpec((C, Cr), lambda n, k: (0, 0)),
                pl.BlockSpec((C, Cr), lambda n, k: (0, 0)),
            ],
            out_specs=pl.BlockSpec((1, C, 1), lambda n, k: (n, 0, 0)),
            scratch_shapes=[pltpu.VMEM((C, 1), jnp.float32)],
        ),
        compiler_params=pltpu.CompilerParams(
            dimension_semantics=("parallel", "arbitrary"),
            vmem_limit_bytes=vmem_limit,
        ),
        cost_estimate=pool_cost,
    )(x3, w1t, w2)

    # Sweep 2: re-stream the HW tiles and apply the per-channel scale.
    apply_cost = pl.CostEstimate(
        flops=int(N * C * HW),
        transcendentals=0,
        bytes_accessed=int(2 * N * C * HW * itemsize + N * C * 4),
    )
    out3 = pl.pallas_call(
        _se_apply_kernel,
        out_shape=jax.ShapeDtypeStruct((N, C, HW), x_nchw.dtype),
        grid_spec=pltpu.PrefetchScalarGridSpec(
            num_scalar_prefetch=0,
            grid=(N, n_tiles),
            in_specs=[
                pl.BlockSpec((1, C, 1), lambda n, k: (n, 0, 0)),
                pl.BlockSpec((1, C, thw), lambda n, k: (n, 0, k)),
            ],
            out_specs=pl.BlockSpec((1, C, thw), lambda n, k: (n, 0, k)),
        ),
        compiler_params=pltpu.CompilerParams(
            dimension_semantics=("parallel", "parallel"),
            vmem_limit_bytes=vmem_limit,
        ),
        cost_estimate=apply_cost,
    )(scale, x3)
    return out3.reshape(N, C, H, W)


def se_module_ref(x_nchw, w_fc1, w_fc2):
    """Pure-JAX reference mirroring the PyTorch forward."""
    pooled = jnp.mean(x_nchw.astype(jnp.float32), axis=(2, 3))   # (N, C)
    h = jnp.maximum(pooled @ w_fc1.T, 0.0)                       # (N, Cr)
    s = jax.nn.sigmoid(h @ w_fc2.T)                              # (N, C)
    return (x_nchw.astype(jnp.float32) * s[:, :, None, None]).astype(x_nchw.dtype)


if __name__ == "__main__":
    key = jax.random.PRNGKey(0)
    kx, k1, k2, kx2, k3, k4 = jax.random.split(key, 6)

    # ---- fast path: whole-image blocks, batch-blocked grid ----
    N, C, H, W = 2, 4, 16, 16
    reduction = 2
    Cr = C // reduction
    x = jax.random.normal(kx, (N, C, H, W), dtype=jnp.float32)
    w_fc1 = jax.random.normal(k1, (Cr, C), dtype=jnp.float32) * 0.1
    w_fc2 = jax.random.normal(k2, (C, Cr), dtype=jnp.float32) * 0.1

    out = jax.block_until_ready(se_module_pallas(x, w_fc1, w_fc2))
    ref = se_module_ref(x, w_fc1, w_fc2)
    assert out.shape == (N, C, H, W)
    assert jnp.allclose(out, ref, atol=2e-5, rtol=2e-5), "fast path mismatch"

    # ---- tiled path: two-sweep HW pipeline with a partial last tile ----
    N2, C2, H2, W2 = 2, 8, 18, 18     # HW = 324 -> tiles of 128 exercise masking
    Cr2 = 4
    x2 = jax.random.normal(kx2, (N2, C2, H2, W2), dtype=jnp.float32)
    w1b = jax.random.normal(k3, (Cr2, C2), dtype=jnp.float32) * 0.1
    w2b = jax.random.normal(k4, (C2, Cr2), dtype=jnp.float32) * 0.1
    out2 = jax.block_until_ready(se_module_pallas(x2, w1b, w2b, force_tile_hw=128))
    ref2 = se_module_ref(x2, w1b, w2b)
    assert out2.shape == (N2, C2, H2, W2)
    assert jnp.allclose(out2, ref2, atol=2e-5, rtol=2e-5), "tiled path mismatch"

    print("KERNEL_OK")
</pallas_src>

<mosaic_0001>
module attributes {stable_mosaic.version = 11 : i64} {
  func.func @_se_fast_kernel(%arg0: i32, %arg1: memref<1x4x256xf32, #tpu.memory_space<vmem>>, %arg2: memref<4x2xf32, #tpu.memory_space<vmem>>, %arg3: memref<4x2xf32, #tpu.memory_space<vmem>>, %arg4: memref<1x4x256xf32, #tpu.memory_space<vmem>>) attributes {dimension_semantics = [#tpu.dimension_semantics<parallel>], iteration_bounds = array<i64: 2>, scalar_prefetch = 0 : i64, scratch_operands = 0 : i64, tpu.core_type = #tpu.core_type<tc>, window_params = [{transform_indices = @transform_0, window_bounds = array<i64: 1, 4, 256>}, {pipeline_mode = #tpu.pipeline_mode<synchronous>, transform_indices = @transform_1, window_bounds = array<i64: 4, 2>}, {pipeline_mode = #tpu.pipeline_mode<synchronous>, transform_indices = @transform_2, window_bounds = array<i64: 4, 2>}, {transform_indices = @transform_3, window_bounds = array<i64: 1, 4, 256>}]} {
    %c0 = arith.constant 0 : index
    %c0_0 = arith.constant 0 : index
    %c0_1 = arith.constant 0 : index
    %0 = vector.load %arg1[%c0, %c0_0, %c0_1] : memref<1x4x256xf32, #tpu.memory_space<vmem>>, vector<1x4x256xf32>
    %cst = arith.constant dense<0.000000e+00> : vector<1x4xf32>
    %1 = vector.multi_reduction <add>, %0, %cst [2] : vector<1x4x256xf32> to vector<1x4xf32>
    %2 = vector.shape_cast %1 : vector<1x4xf32> to vector<1x4x1xf32>
    %cst_2 = arith.constant 3.906250e-03 : f32
    %3 = vector.broadcast %cst_2 : f32 to vector<1x4x1xf32>
    %4 = arith.mulf %2, %3 : vector<1x4x1xf32>
    %c0_3 = arith.constant 0 : index
    %c0_4 = arith.constant 0 : index
    %5 = vector.load %arg2[%c0_3, %c0_4] : memref<4x2xf32, #tpu.memory_space<vmem>>, vector<4x2xf32>
    %6 = vector.shape_cast %5 : vector<4x2xf32> to vector<1x4x2xf32>
    %7 = vector.broadcast %4 : vector<1x4x1xf32> to vector<1x4x2xf32>
    %8 = arith.mulf %6, %7 : vector<1x4x2xf32>
    %cst_5 = arith.constant dense<0.000000e+00> : vector<1x2xf32>
    %9 = vector.multi_reduction <add>, %8, %cst_5 [1] : vector<1x4x2xf32> to vector<1x2xf32>
    %10 = vector.shape_cast %9 : vector<1x2xf32> to vector<1x1x2xf32>
    %cst_6 = arith.constant 0.000000e+00 : f32
    %11 = vector.broadcast %cst_6 : f32 to vector<1x1x2xf32>
    %12 = arith.maximumf %10, %11 : vector<1x1x2xf32>
    %c0_7 = arith.constant 0 : index
    %c0_8 = arith.constant 0 : index
    %13 = vector.load %arg3[%c0_7, %c0_8] : memref<4x2xf32, #tpu.memory_space<vmem>>, vector<4x2xf32>
    %14 = vector.shape_cast %13 : vector<4x2xf32> to vector<1x4x2xf32>
    %15 = vector.broadcast %12 : vector<1x1x2xf32> to vector<1x4x2xf32>
    %16 = arith.mulf %14, %15 : vector<1x4x2xf32>
    %cst_9 = arith.constant dense<0.000000e+00> : vector<1x4xf32>
    %17 = vector.multi_reduction <add>, %16, %cst_9 [2] : vector<1x4x2xf32> to vector<1x4xf32>
    %18 = vector.shape_cast %17 : vector<1x4xf32> to vector<1x4x1xf32>
    %19 = arith.negf %18 : vector<1x4x1xf32>
    %20 = math.exp %19 : vector<1x4x1xf32>
    %cst_10 = arith.constant 1.000000e+00 : f32
    %21 = vector.broadcast %cst_10 : f32 to vector<1x4x1xf32>
    %22 = arith.addf %21, %20 : vector<1x4x1xf32>
    %23 = arith.divf %21, %22 : vector<1x4x1xf32>
    %24 = vector.broadcast %23 : vector<1x4x1xf32> to vector<1x4x256xf32>
    %25 = arith.mulf %0, %24 : vector<1x4x256xf32>
    %c0_11 = arith.constant 0 : index
    %c0_12 = arith.constant 0 : index
    %c0_13 = arith.constant 0 : index
    %26 = vector.load %arg4[%c0_11, %c0_12, %c0_13] : memref<1x4x256xf32, #tpu.memory_space<vmem>>, vector<1x4x256xf32>
    tpu.vector_store %arg4[%c0_11, %c0_12, %c0_13], %25 {strides = array<i32>} : memref<1x4x256xf32, #tpu.memory_space<vmem>>, vector<1x4x256xf32>,
    return
  }
  func.func @transform_0(%arg0: i32) -> (i32, i32, i32) {
    %c0_i32 = arith.constant 0 : i32
    %c0_i32_0 = arith.constant 0 : i32
    %c0_i32_1 = arith.constant 0 : i32
    return %arg0, %c0_i32, %c0_i32_0 : i32, i32, i32
  }
  func.func @transform_1(%arg0: i32) -> (i32, i32) {
    %c0_i32 = arith.constant 0 : i32
    %c0_i32_0 = arith.constant 0 : i32
    %c0_i32_1 = arith.constant 0 : i32
    return %c0_i32, %c0_i32_0 : i32, i32
  }
  func.func @transform_2(%arg0: i32) -> (i32, i32) {
    %c0_i32 = arith.constant 0 : i32
    %c0_i32_0 = arith.constant 0 : i32
    %c0_i32_1 = arith.constant 0 : i32
    return %c0_i32, %c0_i32_0 : i32, i32
  }
  func.func @transform_3(%arg0: i32) -> (i32, i32, i32) {
    %c0_i32 = arith.constant 0 : i32
    %c0_i32_0 = arith.constant 0 : i32
    %c0_i32_1 = arith.constant 0 : i32
    return %arg0, %c0_i32, %c0_i32_0 : i32, i32, i32
  }
}

</mosaic_0001>

<bundles_post_ra>
// kernel: tpu_custom_call.1
= control target key start
LH: loop header
LB: loop body
LE: loop exit
PB: predicated region body
PF: predicated region fallthrough
CT: control target
= control target key end

     0   :  { %8 = vsyncpa [#allocation3], 0  ;;  %s657_s0 = inlined_call_operand.hbm [shape: f32[2,4,256], index: 0, kind: input, shape index: {}]   ;;  %s658_s1 = inlined_call_operand.vmem [shape: f32[4,2], index: 1, kind: input, shape index: {}]   ;;  %s659_s2 = inlined_call_operand.vmem [shape: f32[4,2], index: 2, kind: input, shape index: {}]   ;;  %s660_s3 = inlined_call_operand.hbm [shape: f32[2,4,256], index: 3, kind: output, shape index: {}]  }
   0x1   :  { %10 = vsyncpa [#allocation3 + $0x1], 0 }
   0x2   :  { %11 = vsyncpa [#allocation4], 0 }
   0x3   :  { %13 = vsyncpa [#allocation4 + $0x1], 0  ;;  %s520_s12 = smov 0   ;;  %s522_s13 = smov 0  }
   0x4   :  { %s524_s14 = smov 0   ;;  %s526_s15 = smov 0  }
   0x5 LB: > { %s541_s16 = sadd.s32 4294967295, %s497_s15   ;;  %s333_s17 = sadd.s32 4294967294, %s497_s15   ;;  %s497_s15 = sphi %s526_s15, %s670_s15   ;;  %s493_s14 = sphi %s524_s14, %s669_s14   ;;  %s489_s13 = sphi %s522_s13, %s668_s13   ;;  %s485_s12 = sphi %s520_s12, %s667_s12  }
   0x6   : > { %s545_s18 = sadd.s32 1, %s497_s15   ;;  %s26_s19 = sadd.s32 1, %s493_s14 }
   0x7   : > { %s23_s20 = ssub.s32 %s497_s15, %s545_s18  ;;  %p33_p0 = scmp.ne.s32.totalorder %s493_s14, %s489_s13 }
   0x8   : > { %p24_p1 = scmp.eq.s32.totalorder %s23_s20, 0  ;;  %p34_p2 = scmp.eq.s32.totalorder %s497_s15, 0 }
   0x9   : > { %p39_p3 = scmp.ne.s32.totalorder %s489_s13, %s485_s12  ;;  %p40_p4 = scmp.eq.s32.totalorder %s541_s16, 0 }
   0xa   : > { %s557_s21 = scalar_select %p24_p1, %s493_s14, %s26_s19  }
   0xb   : > { %p559_p5 = por %p34_p2, %p33_p0  ;;  %p563_p6 = por %p40_p4, %p39_p3 }
   0xc   : > { %p105_p7 = scmp.eq.s32.totalorder %s541_s16, 1  ;;  %p111_p8 = scmp.eq.s32.totalorder %s333_s17, 1 }
   0xd   : > { %p362_p10 = scmp.lt.s32.totalorder %s497_s15, 2  ;;  %s137_s26 = sand.u32 1, %s493_s14  }
   0xe   : > { %p570_p11 = por %p105_p7, %p33_p0  ;;  %p574_p12 = por %p111_p8, %p39_p3 }
   0xf   : > { %s348_s27 = sshll.u32 %s497_s15, 3  ;;  %s336_s28 = sshll.u32 %s137_s26, 3 }
  0x10   : > { %s146_s4 = scalar_lea.hbm %s657_s0, %s348_s27  ;;  %s141_s6 = scalar_lea.vmem [#allocation2], %s336_s28 }
  0x11   : > { %s148_s5 = sshll.u32 %s146_s4, 4  ;;  %s150_s7 = sshll.u32 %s141_s6, 4  ;;  %s149_s5 = int_to_ptr.hbm [resolvable:$true] %s148_s5  ;;  %s151_s7 = int_to_ptr.vmem [resolvable:$true] %s150_s7 }
  0x12   : > { %p585_p13 = pnand %p362_p10, %p559_p5  ;;  %p339_p0 = scmp.ge.s32.totalorder %s497_s15, 1 }
  0x13   : > { %p155_p1 = scmp.lt.s32.totalorder %s497_s15, 3  ;;  %s138_s9 = scalar_lea.sflag [#allocation3], %s137_s26 }
  0x14   : > { %s401_s10 = sshra.s32 %s149_s5, 4  ;;  %p405_p3 = pneg %p585_p13  ;;  %s402_s10 = int_to_ptr.hbm [resolvable:$true] %s401_s10 }
  0x15   : > { %s403_s11 = scalar_lea.hbm %s402_s10, 8  ;;  %s408_s20 = scalar_lea.hbm %s657_s0, 16 }
  0x16   : > { %p404_p2 = scmp.ne.s32.totalorder %s402_s10, %s403_s11  ;;  %p409_p5 = scmp.lt.s32.totalorder %s402_s10, %s657_s0 }
  0x17   : > { %p410_p8 = scmp.lt.s32.totalorder %s408_s20, %s403_s11 }
  0x18   : > { %p406_p4 = pnand %p405_p3, %p404_p2 }
  0x19   : > { %p411_p10 = por %p410_p8, %p409_p5 }
  0x1a   : > { %p407_p7 = pneg %p406_p4 }
  0x1c   : > { %p412_p9 = pnand %p411_p10, %p407_p7 }
  0x1e   : > { %415 = shalt.err (!%p412_p9)
}
  0x1f   : > { %357 = dma.hbm_to_vmem [thread:$0]  (!%p585_p13), %s149_s5, 128, %s151_s7, %s138_s9  }
  0x20   : > { %p156_p2 = pnand %p339_p0, %p155_p1 }
  0x21   : > { %s606_s26 = sand.u32 (!%p156_p2), 1, %s489_s13  }
  0x22   : > { %159 = sbr.rel (%p156_p2) target bundleno = 341 (0x155), region = 32  ;;  %s340_s28 = sshll.u32 (!%p156_p2), %s606_s26, 3 }
  0x23   : > { %s162_s29 = scalar_lea.sflag (!%p156_p2), [#allocation3], %s606_s26  ;;  %s165_s30 = scalar_lea.vmem (!%p156_p2), [#allocation2], %s340_s28 }
  0x27   : > { %476 = dma.done.wait (%p563_p6), %s162_s29, 128  }
  0x28   : > { %478 = vsyncadd (%p563_p6), %s162_s29, 4294967168  ;;  %v189_v0 = vld [vmem:[%s165_s30] sm:$0xff]  ;;  %vm196_vm0 = vcmask 1043456   ;;  %v203_v6 = vld [vmem:[%s658_s1] sm:$0xf]  ;;  %vm205_vm1 = vcmask 11264  }
  0x29   : > { %191 = vst [vmem:[#allocation1] ss:$2 sm:$0xff] %v189_v0  ;;  %v214_v17 = vld [vmem:[%s659_s2] sm:$0xf]  ;;  %v499_v28 = vmov 839922192  }
  0x2a   : > { %v240_v29 = vunpack.c.l.s4 %v499_v28  ;;  %s349_s7 = sshll.u32 %s541_s16, 3  ;;  %s188_s11 = scalar_lea.vmem [#allocation5], %s340_s28 }
  0x2b   : > { %s258_s10 = scalar_lea.hbm %s660_s3, %s349_s7  ;;  %s260_s16 = sshll.u32 %s188_s11, 4  ;;  %s261_s16 = int_to_ptr.vmem [resolvable:$true] %s260_s16 }
  0x2c   : > { %v241_v34 = vunpack.c.0.s8 %v240_v29  ;;  %s262_s17 = sshll.u32 %s258_s10, 4  ;;  %s247_s19 = scalar_lea.sflag [#allocation4], %s606_s26  ;;  %s263_s17 = int_to_ptr.hbm [resolvable:$true] %s262_s17 }
  0x2d   : > { %s445_s20 = sshra.s32 %s263_s17, 4  ;;  %s451_s30 = scalar_lea.hbm %s660_s3, 16  ;;  %s446_s20 = int_to_ptr.hbm [resolvable:$true] %s445_s20 }
  0x2e   : > { %s447_s22 = scalar_lea.hbm %s446_s20, 8  ;;  %p452_p0 = scmp.lt.s32.totalorder %s446_s20, %s660_s3 }
  0x2f   : > { %p448_p6 = scmp.ne.s32.totalorder %s446_s20, %s447_s22  ;;  %p453_p1 = scmp.lt.s32.totalorder %s451_s30, %s447_s22 }
  0x30   : > { %v192_v1 = vld.sshfl [vmem:[#allocation1] sm:$0xff pattern:$0x75316420]  ;;  %v193_v2 = vld.sshfl [vmem:[#allocation1 + $0x8] sm:$0xff pattern:$0x75316420] }
  0x31   : > { %v197_v3 = vsel %vm196_vm0, %v192_v1, 0.0  ;;  %v198_v4 = vsel %vm196_vm0, %v193_v2, 0.0  ;;  %p449_p9 = pnand %p448_p6, %p570_p11  ;;  %p454_p3 = por %p453_p1, %p452_p0 }
  0x32   : > { %v199_v5 = vadd.f32 %v198_v4, %v197_v3 }
  0x33   : > { %p450_p13 = pneg %p449_p9 }
  0x34   : > { %200 = vadd.xlane.f32.xlu0 %v199_v5 }
  0x35   : > { %p455_p4 = pnand %p454_p3, %p450_p13 }
  0xa7   : > { %v201_v7 = vpop.xlane.xlu0 %200 }
  0xa8   : > { %v202_v8 = vmul.f32 0.00390625, %v201_v7 }
  0xaa   : > { %v204_v9 = vmul.f32 %v203_v6, %v202_v8 }
  0xac   : > { %v206_v10 = vsel %vm205_vm1, %v204_v9, 0.0 }
  0xad   : > { %v207_v11 = vrot.slane %v206_v10, 4 }
  0xaf   : > { %v208_v12 = vadd.f32 %v207_v11, %v206_v10 }
  0xb1   : > { %v209_v13 = vrot.slane %v208_v12, 2 }
  0xb3   : > { %v210_v14 = vadd.f32 %v209_v13, %v208_v12 }
  0xb5   : > { %v211_v15 = vrot.slane %v210_v14, 1 }
  0xb7   : > { %v212_v16 = vadd.f32 %v211_v15, %v210_v14 }
  0xb9   : > { %v213_v18 = vmax.f32 %v212_v16, 0.0 }
  0xbb   : > { %v215_v19 = vmul.f32 %v214_v17, %v213_v18 }
  0xbd   : > { %v216_v20 = vsel %vm205_vm1, %v215_v19, 0.0 }
  0xbe   : > { %217 = vadd.xlane.f32.xlu0 %v216_v20 }
 0x131   : > { %v218_v21 = vpop.xlane.xlu0 %217 }
 0x132   : > { %v342_v22 = vmul.f32 -1.442695, %v218_v21 }
 0x134   : > { %397 = vpow2.f32 %v342_v22 }
 0x13a   : > { %v398_v23 = vpop.eup %397 }
 0x13b   : > { %v222_v24 = vadd.f32 1.0, %v398_v23 }
 0x13d   : > { %399 = vrcp.f32 %v222_v24  ;;  %v234_v30 = vand.u32 2147483648, %v222_v24  ;;  %v232_v32 = vand.u32 2147483647, %v222_v24  ;;  %vm228_vm3 = vweird.f32 %v222_v24 }
 0x13f   : > { %v235_v35 = vor.u32 1.1754944e-38, %v234_v30  ;;  %vm233_vm5 = vcmp.eq.f32.partialorder %v232_v32, 8.507059e+37 }
 0x143   : > { %v400_v25 = vpop.eup %399 }
 0x144   : > { %v224_v26 = vmul.f32 %v400_v25, %v222_v24  ;;  %vm229_vm2 = vweird.f32 %v400_v25 }
 0x145   : > { %vm230_vm4 = vmor %vm228_vm3, %vm229_vm2 }
 0x146   : > { %v225_v27 = vsub.f32 1.0, %v224_v26 }
 0x148   : > { %v226_v31 = vmul.f32 %v400_v25, %v225_v27 }
 0x14a   : > { %v227_v33 = vadd.f32 %v400_v25, %v226_v31 }
 0x14c   : > { %v231_v36 = vsel %vm230_vm4, %v400_v25, %v227_v33 }
 0x14d   : > { %v236_v37 = vsel %vm233_vm5, %v235_v35, %v231_v36 }
 0x14e   : > { %v242_v38 = vperm.slane %v236_v37, %v241_v34 }
 0x150   : > { %v244_v39 = vmul.f32 %v242_v38, %v189_v0 }
 0x152   : > { %245 = vst [vmem:[%s188_s11] sm:$0xff] %v244_v39 }
 0x153   : > { %458 = shalt.err (!%p455_p4)
}
 0x154   : > { %352 = dma.vmem_to_hbm [thread:$0]  (%p570_p11), %s261_s16, 128, %s263_s17, %s247_s19  }
 0x155 PF: > { %s274_s26 = sand.u32 1, %s485_s12   ;;  %p666_p7 = scmp.ge.s32.totalorder %s497_s15, 2 }
 0x156   : > { %s275_s5 = scalar_lea.sflag [#allocation4], %s274_s26 }
 0x157   : > { %p359_p5 = pnand %p666_p7, %p574_p12 }
 0x159   : > { %p360_p8 = pneg %p359_p5 }
 0x15b   : > { %480 = dma.done.wait (%p360_p8), %s275_s5, 128  }
 0x15c   : > { %482 = vsyncadd (%p360_p8), %s275_s5, 4294967168  ;;  %p16_p10 = scmp.ge.s32.totalorder %s545_s18, 4   ;;  %s667_s12 = smov %s489_s13 }
 0x15d   : > { %s668_s13 = smov %s493_s14  ;;  %s669_s14 = smov %s557_s21 }
 0x15e   : > { %s670_s15 = smov %s545_s18  ;;  %18 = sbr.rel (!%p16_p10) target bundleno = 5 (0x5), region = 77 }
 0x163   :  { %281 = vsyncpa [#allocation3], 1 }
 0x164   :  { %283 = vsyncpa [#allocation3 + $0x1], 1 }
 0x165   :  { %284 = vsyncpa [#allocation4], 1 }
 0x166   :  { %286 = vsyncpa [#allocation4 + $0x1], 1 }

</bundles_post_ra>
